<compile_context>
chip_gen: v7x
topology: tpu7x:2x2x1
jax: 0.10.0
libtpu: 0.0.40
codegen_flags: <defaults>
</compile_context>

<pallas_src>
import jax
import jax.numpy as jnp
from jax.experimental import pallas as pl
from jax.experimental.pallas import tpu as pltpu


_EPS = 1e-12          # matches the module's l2_normalize (clamps the squared sum)
_MiB = 1024 * 1024


def _l2_normalize(x, axis):
    x = x.astype(jnp.float32)
    ss = jnp.sum(x * x, axis=axis, keepdims=True)
    return x * jax.lax.rsqrt(jnp.maximum(ss, jnp.float32(_EPS)))


def _round_up(x, m):
    return -(-x // m) * m


def _vmem_budgets():
    """Generation-aware (input_tile_budget, vmem_limit_bytes, two_core_hint)."""
    cap = 128 * _MiB
    try:
        cap = int(getattr(pltpu.get_tpu_info(), "vmem_capacity_bytes", cap))
    except Exception:
        pass
    if cap <= 64 * _MiB:
        # v7x-class: 64 MiB per TensorCore, 2 TCs/chip -> derate hard and make
        # sure the parallel batch axis has work for both cores.
        return 18 * _MiB, 52 * _MiB, True
    # 128 MiB parts (v5e / v6e): spend the larger VMEM on bigger tiles
    # (fewer grid steps -> closer to the HBM roofline).
    return 56 * _MiB, 100 * _MiB, False


def _choose_tiles(B, N, D, itemsize, input_budget, two_core_hint):
    """Pick (TB, TN) so double-buffered input + the live f32 upcast temp fit."""
    # Per (batch-row, token) element: 2x double-buffered native-dtype input
    # tile plus the in-kernel f32 temp produced by the .astype(float32).
    per_bt = (2 * itemsize + 4) * D
    per_row = per_bt * N
    if per_row <= input_budget:
        tb = max(1, input_budget // per_row)
        if two_core_hint and B > 8:
            # keep >= 2 sublane-aligned batch steps so both v7x TCs get work
            tb = min(tb, _round_up(pl.cdiv(B, 2), 8))
        if tb >= B:
            tb = B
        elif tb > 8:
            tb = (tb // 8) * 8          # sublane-friendly batch tiles
        return int(tb), N
    # A single batch row with all its tokens does not fit: tile the token axis.
    tn = max(1, input_budget // per_bt)
    if tn >= N:
        tn = N
    elif tn > 8:
        tn = (tn // 8) * 8
    return 1, int(tn)


# --------------------------------------------------------------------------
# Kernel: mean-pool over tokens (streamed over a token grid axis with a VMEM
# accumulator), L2-normalize the query, similarity matmul against the
# resident normalized prompt keys.
# --------------------------------------------------------------------------
def prompt_similarity(x_embed, prompt_key_norm, tile_override=None):
    """Returns (similarity (B, P) f32, x_embed_norm (B, D) f32)."""
    B, N, D = x_embed.shape
    P, _ = prompt_key_norm.shape
    itemsize = jnp.dtype(x_embed.dtype).itemsize

    input_budget, vmem_limit, two_core_hint = _vmem_budgets()
    if tile_override is not None:
        TB, TN = tile_override
    else:
        TB, TN = _choose_tiles(B, N, D, itemsize, input_budget, two_core_hint)
    nb = pl.cdiv(B, TB)
    nt = pl.cdiv(N, TN)
    masked_tokens = (N % TN) != 0   # static: pad tokens must not pollute the sum

    def kernel(x_ref, knorm_ref, sim_ref, xnorm_ref, acc_ref):
        t = pl.program_id(1)

        @pl.when(t == 0)
        def _():
            acc_ref[...] = jnp.zeros_like(acc_ref)

        x = x_ref[...].astype(jnp.float32)              # (TB, TN, D)
        if masked_tokens:
            tok = jax.lax.broadcasted_iota(jnp.int32, (1, TN, 1), 1)
            x = jnp.where(tok < (N - t * TN), x, 0.0)
        acc_ref[...] += jnp.sum(x, axis=1)              # (TB, D) f32 token sum

        @pl.when(t == pl.num_programs(1) - 1)
        def _():
            # embedding_key == 'mean'
            x_mean = acc_ref[...] * jnp.float32(1.0 / N)
            # l2_normalize(x_embed_mean, dim=1) (clamp on squared sum)
            ss = jnp.sum(x_mean * x_mean, axis=1, keepdims=True)
            x_norm = x_mean * jax.lax.rsqrt(jnp.maximum(ss, jnp.float32(_EPS)))
            xnorm_ref[...] = x_norm
            # similarity = x_norm @ key_norm.T without materializing the
            # transpose: contract the last axis of both operands on the MXU.
            sim_ref[...] = jax.lax.dot_general(
                x_norm, knorm_ref[...],
                dimension_numbers=(((1,), (1,)), ((), ())),
                preferred_element_type=jnp.float32)

    cost = pl.CostEstimate(
        flops=2 * B * N * D + 2 * B * P * D + 4 * B * D,
        transcendentals=B,
        bytes_accessed=B * N * D * itemsize + P * D * 4 + B * (P + D) * 4)

    return pl.pallas_call(
        kernel,
        out_shape=(
            jax.ShapeDtypeStruct((B, P), jnp.float32),   # similarity
            jax.ShapeDtypeStruct((B, D), jnp.float32),   # x_embed_norm
        ),
        grid=(nb, nt),
        in_specs=[
            pl.BlockSpec((TB, TN, D), lambda b, t: (b, t, 0)),  # streamed input
            pl.BlockSpec((P, D), lambda b, t: (0, 0)),          # keys stay resident
        ],
        out_specs=(
            pl.BlockSpec((TB, P), lambda b, t: (b, 0)),
            pl.BlockSpec((TB, D), lambda b, t: (b, 0)),
        ),
        scratch_shapes=[pltpu.VMEM((TB, D), jnp.float32)],
        compiler_params=pltpu.CompilerParams(
            dimension_semantics=("parallel", "arbitrary"),
            vmem_limit_bytes=int(vmem_limit)),
        cost_estimate=cost,
    )(x_embed, prompt_key_norm)
    # TODO(synk): if profiles show exposed DMA gaps with many grid steps,
    # consider pipeline_mode=pl.Buffered(3) on the x_embed BlockSpec (trades
    # VMEM against tile size, so only after the bundle confirms it).


# --------------------------------------------------------------------------
# Module port
# --------------------------------------------------------------------------
class PromptPallas:
    """JAX/Pallas port of the PyTorch `Prompt` module (prompt_init='uniform')."""

    def __init__(self, length=5, embed_dim=32, pool_size=4, top_k=2,
                 num_tasks=2, rng_key=None):
        self.length = length
        self.embed_dim = embed_dim
        self.pool_size = pool_size
        self.top_k = top_k
        self.num_tasks = num_tasks

        if rng_key is None:
            rng_key = jax.random.PRNGKey(42)
        keys = jax.random.split(rng_key, 2 * num_tasks)

        # nn.init.uniform_(param, -1, 1) -> deterministic synthetic init
        self.prompt_list = [
            jax.random.uniform(keys[2 * i], (pool_size, length, embed_dim),
                               dtype=jnp.float32, minval=-1.0, maxval=1.0)
            for i in range(num_tasks)
        ]
        self.prompt_key_list = [
            jax.random.uniform(keys[2 * i + 1], (pool_size, embed_dim),
                               dtype=jnp.float32, minval=-1.0, maxval=1.0)
            for i in range(num_tasks)
        ]

    def forward(self, x_embed, prompt_mask=None, cls_features=None,
                is_training=True, task_id=0):
        assert prompt_mask is None, "prompt_mask must be None!"
        if is_training:
            prompt = self.prompt_list[task_id]
            prompt_key = self.prompt_key_list[task_id]
        else:
            # Eval path in the reference concatenates prompts of seen tasks.
            prompt = jnp.concatenate(self.prompt_list[:task_id + 1], axis=0)
            prompt_key = jnp.concatenate(self.prompt_key_list[:task_id + 1], axis=0)

        B = x_embed.shape[0]

        # Key normalization: tiny (P, D) op — plain jnp, XLA fuses it for free
        # (dropping the previous standalone pallas_call removes its dispatch
        # and HBM round-trip).
        prompt_key_norm = _l2_normalize(prompt_key, axis=1)

        # Pallas: mean-pool over tokens + query L2-norm + similarity matmul.
        similarity, x_embed_norm = prompt_similarity(x_embed, prompt_key_norm)

        # --- glue (tiny index work) ---
        topk_similarity, idx = jax.lax.top_k(similarity, self.top_k)   # (B, K)

        batched_prompt_raw = prompt[idx]                    # (B, K, L, D)
        _, top_k, length, c = batched_prompt_raw.shape
        batched_prompt = batched_prompt_raw.reshape(B, top_k * length, c)

        batched_key_norm = prompt_key_norm[idx]             # (B, K, D)

        out = {}
        out['prompt_idx'] = idx
        out['prompt_key_norm'] = prompt_key_norm
        out['x_embed_norm'] = x_embed_norm
        out['similarity'] = similarity
        out['selected_key'] = batched_key_norm.reshape(B, top_k * c)
        out['selected_prompt'] = batched_prompt.reshape(B, top_k * length * c)

        # sum_{b,k} ( key_norm[idx[b,k]] . x_norm[b] ) / B == sum(topk_sim) / B
        out['reduce_sim'] = jnp.sum(topk_similarity) / x_embed.shape[0]
        out['topk_similarity'] = topk_similarity

        out['total_prompt_len'] = batched_prompt.shape[1]
        # torch.cat([x_embed], dim=1) is just x_embed
        out['prompted_embedding'] = x_embed
        return out


if __name__ == "__main__":
    key = jax.random.PRNGKey(0)
    k_x, k_params, k_x2, k_key2 = jax.random.split(key, 4)

    B, N, D = 2, 8, 32          # batch, tokens, embed_dim
    pool_size, length, top_k = 4, 5, 2

    x_embed = jax.random.normal(k_x, (B, N, D), dtype=jnp.float32)

    module = PromptPallas(length=length, embed_dim=D, pool_size=pool_size,
                          top_k=top_k, num_tasks=2, rng_key=k_params)

    out = module.forward(x_embed, is_training=True, task_id=0)
    jax.block_until_ready(out['similarity'])
    jax.block_until_ready(out['reduce_sim'])
    jax.block_until_ready(out['prompted_embedding'])

    # shape sanity checks
    assert out['similarity'].shape == (B, pool_size)
    assert out['prompt_idx'].shape == (B, top_k)
    assert out['selected_prompt'].shape == (B, top_k * length * D)
    assert out['total_prompt_len'] == top_k * length

    # numeric check of the hot path against a plain-JAX reference
    xm = jnp.mean(x_embed, axis=1)
    xr = xm * jax.lax.rsqrt(jnp.maximum(jnp.sum(xm * xm, 1, keepdims=True), _EPS))
    pk = module.prompt_key_list[0]
    kr = pk * jax.lax.rsqrt(jnp.maximum(jnp.sum(pk * pk, 1, keepdims=True), _EPS))
    sim_ref = xr @ kr.T
    assert jnp.allclose(out['similarity'], sim_ref, atol=1e-5, rtol=1e-5)
    assert jnp.allclose(out['x_embed_norm'], xr, atol=1e-6, rtol=1e-6)
    assert jnp.allclose(out['reduce_sim'],
                        jnp.sum(jax.lax.top_k(sim_ref, top_k)[0]) / B,
                        atol=1e-5, rtol=1e-5)

    # exercise the token-tiled (reduction-axis) path, including the padded
    # (non-divisible N) masking, with a forced tile override
    N2 = 12
    x2 = jax.random.normal(k_x2, (B, N2, D), dtype=jnp.float32)
    key2 = jax.random.uniform(k_key2, (pool_size, D), dtype=jnp.float32,
                              minval=-1.0, maxval=1.0)
    key2_norm = _l2_normalize(key2, axis=1)
    sim2, xnorm2 = prompt_similarity(x2, key2_norm, tile_override=(B, 8))
    jax.block_until_ready(sim2)
    xm2 = jnp.mean(x2, axis=1)
    xr2 = xm2 * jax.lax.rsqrt(jnp.maximum(jnp.sum(xm2 * xm2, 1, keepdims=True), _EPS))
    assert jnp.allclose(sim2, xr2 @ key2_norm.T, atol=1e-5, rtol=1e-5)
    assert jnp.allclose(xnorm2, xr2, atol=1e-5, rtol=1e-5)

    print("KERNEL_OK")
</pallas_src>

<mosaic_0001>
module attributes {stable_mosaic.version = 11 : i64} {
  func.func @kernel(%arg0: i32, %arg1: i32, %arg2: memref<2x8x32xf32, #tpu.memory_space<vmem>>, %arg3: memref<4x32xf32, #tpu.memory_space<vmem>>, %arg4: memref<2x4xf32, #tpu.memory_space<vmem>>, %arg5: memref<2x32xf32, #tpu.memory_space<vmem>>, %arg6: memref<2x32xf32, #tpu.memory_space<vmem>>) attributes {dimension_semantics = [#tpu.dimension_semantics<parallel>, #tpu.dimension_semantics<arbitrary>], iteration_bounds = array<i64: 1, 1>, scalar_prefetch = 0 : i64, scratch_operands = 1 : i64, tpu.core_type = #tpu.core_type<tc>, window_params = [{transform_indices = @transform_0, window_bounds = array<i64: 2, 8, 32>}, {pipeline_mode = #tpu.pipeline_mode<synchronous>, transform_indices = @transform_1, window_bounds = array<i64: 4, 32>}, {transform_indices = @transform_2, window_bounds = array<i64: 2, 4>}, {transform_indices = @transform_3, window_bounds = array<i64: 2, 32>}]} {
    %c0_i32 = arith.constant 0 : i32
    %0 = arith.cmpi eq, %arg1, %c0_i32 : i32
    %1 = arith.extui %0 : i1 to i32
    %c0_i32_0 = arith.constant 0 : i32
    %2 = arith.cmpi ne, %1, %c0_i32_0 : i32
    scf.if %2 {
      %cst_9 = arith.constant 0.000000e+00 : f32
      %11 = vector.broadcast %cst_9 : f32 to vector<2x32xf32>
      %c0_10 = arith.constant 0 : index
      %c0_11 = arith.constant 0 : index
      %12 = vector.load %arg6[%c0_10, %c0_11] : memref<2x32xf32, #tpu.memory_space<vmem>>, vector<2x32xf32>
      tpu.vector_store %arg6[%c0_10, %c0_11], %11 {strides = array<i32>} : memref<2x32xf32, #tpu.memory_space<vmem>>, vector<2x32xf32>,
    } else {
    }
    %c0 = arith.constant 0 : index
    %c0_1 = arith.constant 0 : index
    %c0_2 = arith.constant 0 : index
    %3 = vector.load %arg2[%c0, %c0_1, %c0_2] : memref<2x8x32xf32, #tpu.memory_space<vmem>>, vector<2x8x32xf32>
    %c0_3 = arith.constant 0 : index
    %c0_4 = arith.constant 0 : index
    %4 = vector.load %arg6[%c0_3, %c0_4] : memref<2x32xf32, #tpu.memory_space<vmem>>, vector<2x32xf32>
    %cst = arith.constant dense<0.000000e+00> : vector<2x32xf32>
    %5 = vector.multi_reduction <add>, %3, %cst [1] : vector<2x8x32xf32> to vector<2x32xf32>
    %6 = arith.addf %4, %5 : vector<2x32xf32>
    %c0_5 = arith.constant 0 : index
    %c0_6 = arith.constant 0 : index
    %7 = vector.load %arg6[%c0_5, %c0_6] : memref<2x32xf32, #tpu.memory_space<vmem>>, vector<2x32xf32>
    tpu.vector_store %arg6[%c0_5, %c0_6], %6 {strides = array<i32>} : memref<2x32xf32, #tpu.memory_space<vmem>>, vector<2x32xf32>,
    %c0_i32_7 = arith.constant 0 : i32
    %8 = arith.cmpi eq, %arg1, %c0_i32_7 : i32
    %9 = arith.extui %8 : i1 to i32
    %c0_i32_8 = arith.constant 0 : i32
    %10 = arith.cmpi ne, %9, %c0_i32_8 : i32
    scf.if %10 {
      %c0_9 = arith.constant 0 : index
      %c0_10 = arith.constant 0 : index
      %11 = vector.load %arg6[%c0_9, %c0_10] : memref<2x32xf32, #tpu.memory_space<vmem>>, vector<2x32xf32>
      %cst_11 = arith.constant 1.250000e-01 : f32
      %12 = vector.broadcast %cst_11 : f32 to vector<2x32xf32>
      %13 = arith.mulf %11, %12 : vector<2x32xf32>
      %14 = arith.mulf %13, %13 : vector<2x32xf32>
      %cst_12 = arith.constant dense<0.000000e+00> : vector<2xf32>
      %15 = vector.multi_reduction <add>, %14, %cst_12 [1] : vector<2x32xf32> to vector<2xf32>
      %16 = vector.shape_cast %15 : vector<2xf32> to vector<2x1xf32>
      %cst_13 = arith.constant 9.99999996E-13 : f32
      %17 = vector.broadcast %cst_13 : f32 to vector<2x1xf32>
      %18 = arith.maximumf %16, %17 : vector<2x1xf32>
      %19 = math.rsqrt %18 : vector<2x1xf32>
      %20 = vector.broadcast %19 : vector<2x1xf32> to vector<2x32xf32>
      %21 = arith.mulf %13, %20 : vector<2x32xf32>
      %c0_14 = arith.constant 0 : index
      %c0_15 = arith.constant 0 : index
      %22 = vector.load %arg5[%c0_14, %c0_15] : memref<2x32xf32, #tpu.memory_space<vmem>>, vector<2x32xf32>
      tpu.vector_store %arg5[%c0_14, %c0_15], %21 {strides = array<i32>} : memref<2x32xf32, #tpu.memory_space<vmem>>, vector<2x32xf32>,
      %c0_16 = arith.constant 0 : index
      %c0_17 = arith.constant 0 : index
      %23 = vector.load %arg3[%c0_16, %c0_17] : memref<4x32xf32, #tpu.memory_space<vmem>>, vector<4x32xf32>
      %cst_18 = arith.constant dense<0.000000e+00> : vector<2x4xf32>
      %24 = tpu.matmul %21, %23, %cst_18 {dimension_numbers = #tpu.dot_dimension_numbers<[1], [1], [0], [0], [0, 0, 1, 0], [], []>} : vector<2x32xf32>, vector<4x32xf32>, vector<2x4xf32> -> vector<2x4xf32>
      %c0_19 = arith.constant 0 : index
      %c0_20 = arith.constant 0 : index
      %25 = vector.load %arg4[%c0_19, %c0_20] : memref<2x4xf32, #tpu.memory_space<vmem>>, vector<2x4xf32>
      tpu.vector_store %arg4[%c0_19, %c0_20], %24 {strides = array<i32>} : memref<2x4xf32, #tpu.memory_space<vmem>>, vector<2x4xf32>,
    } else {
    }
    return
  }
  func.func @transform_0(%arg0: i32, %arg1: i32) -> (i32, i32, i32) {
    %c0_i32 = arith.constant 0 : i32
    %c0_i32_0 = arith.constant 0 : i32
    return %arg0, %arg1, %c0_i32 : i32, i32, i32
  }
  func.func @transform_1(%arg0: i32, %arg1: i32) -> (i32, i32) {
    %c0_i32 = arith.constant 0 : i32
    %c0_i32_0 = arith.constant 0 : i32
    %c0_i32_1 = arith.constant 0 : i32
    return %c0_i32, %c0_i32_0 : i32, i32
  }
  func.func @transform_2(%arg0: i32, %arg1: i32) -> (i32, i32) {
    %c0_i32 = arith.constant 0 : i32
    %c0_i32_0 = arith.constant 0 : i32
    return %arg0, %c0_i32 : i32, i32
  }
  func.func @transform_3(%arg0: i32, %arg1: i32) -> (i32, i32) {
    %c0_i32 = arith.constant 0 : i32
    %c0_i32_0 = arith.constant 0 : i32
    return %arg0, %c0_i32 : i32, i32
  }
}

</mosaic_0001>

<bundles_post_ra>
// kernel: tpu_custom_call.1
= control target key start
LH: loop header
LB: loop body
LE: loop exit
PB: predicated region body
PF: predicated region fallthrough
CT: control target
= control target key end

     0   :  { %9 = vsyncpa [#allocation4], 0  ;;  %s394_s0 = inlined_call_operand.hbm [shape: f32[2,8,32], index: 0, kind: input, shape index: {}]   ;;  %s395_s1 = inlined_call_operand.hbm [shape: f32[4,32], index: 1, kind: input, shape index: {}]   ;;  %s396_s2 = inlined_call_operand.hbm [shape: f32[2,4], index: 2, kind: output, shape index: {0}]   ;;  %s397_s3 = inlined_call_operand.hbm [shape: f32[2,32], index: 3, kind: output, shape index: {1}]  }
   0x1   :  { %10 = vsyncpa [#allocation7], 0 }
   0x2   :  { %11 = vsyncpa [#allocation5], 0 }
   0x3   :  { %12 = vsyncpa [#allocation10], 0  ;;  %s310_s12 = smov [#allocation3]   ;;  %s214_s16 = scalar_lea.hbm %s394_s0, 256 }
   0x4   :  { %s18_s13 = sshll.u32 %s310_s12, 4  ;;  %p215_p0 = scmp.ne.s32.totalorder %s394_s0, %s214_s16  ;;  %s19_s13 = int_to_ptr.vmem [resolvable:$true] %s18_s13 }
   0x5   :  { %p218_p1 = scmp.lt.u32.totalorder %s214_s16, %s394_s0 }
   0x7   :  { %p220_p2 = pnand %p218_p1, %p215_p0 }
   0x9   :  { %223 = shalt.err (!%p220_p2)
}
   0xa   :  { %s224_s21 = scalar_lea.vmem %s19_s13, 256  ;;  %p229_p4 = scmp.lt.s32.totalorder %s19_s13, %s19_s13 }
   0xb   :  { %p225_p3 = scmp.ne.s32.totalorder %s19_s13, %s224_s21  ;;  %p230_p5 = scmp.lt.s32.totalorder %s224_s21, %s224_s21 }
   0xd   :  { %p231_p6 = por %p230_p5, %p229_p4 }
   0xf   :  { %p232_p7 = pnand %p231_p6, %p225_p3 }
  0x11   :  { %235 = shalt.err (!%p232_p7)
}
  0x12   :  { %s311_s22 = smov 128   ;;  %s312_s23 = smov 8  }
  0x13   :  { %24 = dma.hbm_to_vmem [thread:$0]  %s394_s0, 256, %s19_s13, [#allocation4], %s311_s22, %s311_s22, %s312_s23  }
  0x14   :  { %s313_s26 = smov [#allocation6]   ;;  %s236_s30 = scalar_lea.hbm %s395_s1, 64 }
  0x15   :  { %s31_s27 = sshll.u32 %s313_s26, 4  ;;  %p237_p8 = scmp.ne.s32.totalorder %s395_s1, %s236_s30  ;;  %s32_s27 = int_to_ptr.vmem [resolvable:$true] %s31_s27 }
  0x16   :  { %p240_p9 = scmp.lt.u32.totalorder %s236_s30, %s395_s1 }
  0x18   :  { %p242_p10 = pnand %p240_p9, %p237_p8 }
  0x1a   :  { %245 = shalt.err (!%p242_p10)
}
  0x1b   :  { %s246_s8 = scalar_lea.vmem %s32_s27, 64  ;;  %p251_p12 = scmp.lt.s32.totalorder %s32_s27, %s32_s27 }
  0x1c   :  { %p247_p11 = scmp.ne.s32.totalorder %s32_s27, %s246_s8  ;;  %p252_p13 = scmp.lt.s32.totalorder %s246_s8, %s246_s8 }
  0x1e   :  { %p253_p0 = por %p252_p13, %p251_p12 }
  0x20   :  { %p254_p1 = pnand %p253_p0, %p247_p11 }
  0x22   :  { %257 = shalt.err (!%p254_p1)
}
  0x23   :  { %34 = dma.hbm_to_vmem [thread:$0]  %s395_s1, 64, %s32_s27, [#allocation7]  }
  0x24   :  { %302 = dma.done.wait [#allocation4], 256  }
  0x25   :  { %303 = vsyncadd [#allocation4], 4294967040 }
  0x26   :  { %304 = dma.done.wait [#allocation7], 64  }
  0x27   :  { %305 = vsyncadd [#allocation7], 4294967232  ;;  %vm45_vm0 = vcmask 254976   ;;  %v314_v0 = vmov 0.0   ;;  %vm50_vm1 = vcmask 261120   ;;  %v47_v1 = vld [vmem:[#allocation3] sm:$0xff] }
  0x28   :  { %46 = vst.msk [vmem:[#allocation2] sm:$0x3] %vm45_vm0, %v314_v0  ;;  %199 = vmatprep.subr.mxu0 %v314_v0  ;;  %v48_v2 = vld [vmem:[#allocation3 + $0x8] sm:$0xff]  ;;  %v51_v3 = vsel %vm50_vm1, %v47_v1, 0.0  ;;  %vm67_vm2 = vcmask 1041409   ;;  %vm315_vm3 = vmmov 0  }
  0x29   :  { %v58_v4 = vsel %vm50_vm1, %v48_v2, 0.0  ;;  %v52_v5 = vrot.slane %v51_v3, 4  ;;  %v86_v24 = vld [vmem:[#allocation6] sm:$0xf]  ;;  %201 = vmatprep.mubr.msk.f32.mxu0 %vm315_vm3, %v314_v0  ;;  %s316_s1 = smov [#allocation9]  }
  0x2a   :  { %v59_v6 = vrot.slane %v58_v4, 4  ;;  %200 = vmatpush3.xpose.msk.msra.mxu0 %vm50_vm1, %v86_v24  ;;  %s181_s10 = sshll.u32 %s316_s1, 4  ;;  %s182_s10 = int_to_ptr.vmem [resolvable:$true] %s181_s10 }
  0x2b   :  { %v53_v7 = vadd.f32 %v52_v5, %v51_v3  ;;  %s258_s11 = scalar_lea.vmem %s182_s10, 32  ;;  %p263_p3 = scmp.lt.s32.totalorder %s182_s10, %s182_s10 }
  0x2c   :  { %v60_v8 = vadd.f32 %v59_v6, %v58_v4  ;;  %p259_p2 = scmp.ne.s32.totalorder %s182_s10, %s258_s11  ;;  %p264_p4 = scmp.lt.s32.totalorder %s258_s11, %s258_s11 }
  0x2d   :  { %v54_v9 = vrot.slane %v53_v7, 2 }
  0x2e   :  { %v61_v10 = vrot.slane %v60_v8, 2  ;;  %p265_p5 = por %p264_p4, %p263_p3 }
  0x2f   :  { %v55_v11 = vadd.f32 %v54_v9, %v53_v7  ;;  %v49_v15 = vld [vmem:[#allocation2] sm:$0x3] }
  0x30   :  { %v62_v12 = vadd.f32 %v61_v10, %v60_v8  ;;  %p266_p6 = pnand %p265_p5, %p259_p2 }
  0x31   :  { %v56_v13 = vrot.slane %v55_v11, 1 }
  0x32   :  { %v63_v14 = vrot.slane %v62_v12, 1 }
  0x33   :  { %v57_v16 = vadd.f32 %v56_v13, %v55_v11 }
  0x34   :  { %v64_v17 = vadd.f32 %v63_v14, %v62_v12 }
  0x36   :  { %v68_v18 = vsel %vm67_vm2, %v64_v17, %v57_v16 }
  0x37   :  { %v70_v19 = vadd.f32 %v68_v18, %v49_v15 }
  0x39   :  { %72 = vst.msk [vmem:[#allocation2] sm:$0x3] %vm45_vm0, %v70_v19 }
  0x40   :  { %v76_v20 = vld [vmem:[#allocation2] sm:$0x3] }
  0x41   :  { %v77_v21 = vmul.f32 0.125, %v76_v20 }
  0x43   :  { %v78_v22 = vmul.f32 %v77_v21, %v77_v21 }
  0x45   :  { %v79_v23 = vsel %vm45_vm0, %v78_v22, 0.0 }
  0x46   :  { %80 = vadd.xlane.f32.xlu0 %v79_v23 }
  0xd3   :  { %v81_v25 = vpop.xlane.xlu0 %80 }
  0xd4   :  { %v82_v26 = vmax.f32 %v81_v25, 1e-12 }
  0xd6   :  { %212 = vrsqrt.f32 %v82_v26 }
  0xe0   :  { %v213_v27 = vpop.eup %212 }
  0xe1   :  { %v84_v28 = vmul.f32 %v213_v27, %v77_v21 }
  0xe3   :  { %202 = vmatmul.mubr.msk.f32.vlgmr.msra.gmra.mrb[0].mxu0 %vm50_vm1, %v84_v28  ;;  %85 = vst.msk [vmem:[#allocation9] sm:$0x3] %vm45_vm0, %v84_v28 }
  0xe4   :  { %269 = shalt.err (!%p266_p6)
}
  0xe5   :  { %s270_s14 = scalar_lea.hbm %s397_s3, 32 }
  0xe6   :  { %p271_p7 = scmp.ne.s32.totalorder %s397_s3, %s270_s14  ;;  %p274_p8 = scmp.lt.u32.totalorder %s270_s14, %s397_s3 }
  0xe8   :  { %p276_p9 = pnand %p274_p8, %p271_p7 }
  0xea   :  { %279 = shalt.err (!%p276_p9)
}
  0xeb   :  { %184 = dma.vmem_to_hbm [thread:$0]  %s182_s10, 32, %s397_s3, [#allocation10]   ;;  %vm163_vm4 = vcmask 25600  }
  0xec   :  { %s317_s21 = smov [#allocation8]  }
  0xed   :  { %s171_s22 = sshll.u32 %s317_s21, 4  ;;  %s172_s22 = int_to_ptr.vmem [resolvable:$true] %s171_s22 }
  0xee   :  { %s280_s23 = scalar_lea.vmem %s172_s22, 32  ;;  %p285_p11 = scmp.lt.s32.totalorder %s172_s22, %s172_s22 }
  0xef   :  { %p281_p10 = scmp.ne.s32.totalorder %s172_s22, %s280_s23  ;;  %p286_p12 = scmp.lt.s32.totalorder %s280_s23, %s280_s23 }
  0xf1   :  { %p287_p13 = por %p286_p12, %p285_p11 }
  0xf3   :  { %p288_p0 = pnand %p287_p13, %p281_p10 }
 0x1b6   :  { %v159_v29 = vpop.f32.mrb[0].mxu0 }
 0x1b7   :  { %v203_v30 = vpop.f32.mrb[1].mxu0  ;;  %164 = vst.msk [vmem:[#allocation8] sm:$0x3] %vm163_vm4, %v159_v29 }
 0x1b8   :  { %291 = shalt.err (!%p288_p0)
}
 0x1b9   :  { %s292_s26 = scalar_lea.hbm %s396_s2, 32 }
 0x1ba   :  { %p293_p1 = scmp.ne.s32.totalorder %s396_s2, %s292_s26  ;;  %p296_p2 = scmp.lt.u32.totalorder %s292_s26, %s396_s2 }
 0x1bc   :  { %p298_p3 = pnand %p296_p2, %p293_p1 }
 0x1be   :  { %301 = shalt.err (!%p298_p3)
}
 0x1bf   :  { %174 = dma.vmem_to_hbm [thread:$0]  %s172_s22, 32, %s396_s2, [#allocation5]  }
 0x1c0   :  { %306 = dma.done.wait [#allocation5], 32  }
 0x1c1   :  { %307 = vsyncadd [#allocation5], 4294967264 }
 0x1c2   :  { %308 = dma.done.wait [#allocation10], 32  }
 0x1c3   :  { %309 = vsyncadd [#allocation10], 4294967264 }
 0x1c4   :  { %191 = vsyncpa [#allocation4], 1 }
 0x1c5   :  { %192 = vsyncpa [#allocation7], 1 }
 0x1c6   :  { %193 = vsyncpa [#allocation5], 1 }
 0x1c7   :  { %194 = vsyncpa [#allocation10], 1 }

</bundles_post_ra>
